<compile_context>
chip_gen: v5e
topology: v5e:2x2
jax: 0.10.0
libtpu: 0.0.40
codegen_flags: <defaults>
</compile_context>

<pallas_src>
import functools

import jax
import jax.numpy as jnp
from jax import lax
from jax.experimental import pallas as pl
from jax.experimental.pallas import tpu as pltpu


def _vicreg_kernel(x_ref, y_ref, loss_ref, xsum_ref,
                   xs, xg, ys, yg, ssd,
                   *, n, d, tn, sim_w, var_w, cov_w, eps):
    step = pl.program_id(0)

    @pl.when(step == 0)
    def _init():
        xs[...] = jnp.zeros_like(xs)
        xg[...] = jnp.zeros_like(xg)
        ys[...] = jnp.zeros_like(ys)
        yg[...] = jnp.zeros_like(yg)
        ssd[...] = jnp.zeros_like(ssd)

    # Inputs stream in their native dtype; upcast only on the VPU path.
    x_nat = x_ref[...]
    y_nat = y_ref[...]
    x = x_nat.astype(jnp.float32)
    y = y_nat.astype(jnp.float32)

    # MXU Gram in native dtype (bf16 feeds the MXU directly on v6e/v7x),
    # accumulation in f32.
    def _mxu_operand(z_nat, z_f32):
        if z_nat.dtype in (jnp.dtype(jnp.bfloat16), jnp.dtype(jnp.float32)):
            return z_nat
        return z_f32

    xm = _mxu_operand(x_nat, x)
    ym = _mxu_operand(y_nat, y)
    dims = (((0,), (0,)), ((), ()))
    xg[...] += lax.dot_general(xm, xm, dims, preferred_element_type=jnp.float32)
    yg[...] += lax.dot_general(ym, ym, dims, preferred_element_type=jnp.float32)

    diff = x - y
    dsq = diff * diff

    if tn % 8 == 0 and tn >= 8:
        # Sublane-full accumulation: keep 8 partial rows, combine at finalize.
        xs[...] += jnp.sum(x.reshape(tn // 8, 8, d), axis=0)
        ys[...] += jnp.sum(y.reshape(tn // 8, 8, d), axis=0)
        ssd[...] += jnp.sum(dsq.reshape(tn // 8, 8, d), axis=0)
    else:
        # Rare fallback (single full-slab block with N not a multiple of 8).
        xs[0:1, :] += jnp.sum(x, axis=0, keepdims=True)
        ys[0:1, :] += jnp.sum(y, axis=0, keepdims=True)
        ssd[0:1, :] += jnp.sum(dsq, axis=0, keepdims=True)

    @pl.when(step == pl.num_programs(0) - 1)
    def _finalize():
        n_f = jnp.float32(n)
        inv_n = jnp.float32(1.0 / n)
        inv_nm1 = jnp.float32(1.0 / max(n - 1, 1))
        inv_d = jnp.float32(1.0 / d)
        eps_f = jnp.float32(eps)

        ii = lax.broadcasted_iota(jnp.int32, (d, d), 0)
        jj = lax.broadcasted_iota(jnp.int32, (d, d), 1)
        diag_mask = ii == jj

        def var_and_cov_loss(sum8, gram):
            col_sum = jnp.sum(sum8, axis=0, keepdims=True)            # (1, D)
            mean = col_sum * inv_n                                     # (1, D)
            # diag(Z^T Z) == per-column sum of squares (one-time extraction).
            diag_g = jnp.sum(jnp.where(diag_mask, gram, 0.0),
                             axis=0, keepdims=True)                   # (1, D)
            var = (diag_g - n_f * mean * mean) * inv_nm1               # (1, D)
            std = jnp.sqrt(var + eps_f)
            var_loss = jnp.sum(jnp.maximum(1.0 - std, 0.0)) * inv_d
            # cov = (G - N m^T m)/(N-1); diag(cov) == var, so
            #   sum(off_diag(cov)^2) = sum(cov^2) - sum(var^2)
            # with sum(cov^2) expanded so no (D,D) temporaries are built:
            #   sum(cov^2) = (sum(G^2) - 2N (m G m^T) + N^2 (sum m^2)^2)/(N-1)^2
            sum_g2 = jnp.sum(gram * gram)
            gm = lax.dot_general(mean, gram, (((1,), (0,)), ((), ())),
                                 preferred_element_type=jnp.float32)  # (1, D)
            mgm = jnp.sum(gm * mean)
            sum_m2 = jnp.sum(mean * mean)
            sum_cov2 = (sum_g2 - 2.0 * n_f * mgm
                        + (n_f * sum_m2) * (n_f * sum_m2)) * (inv_nm1 * inv_nm1)
            cov_loss = (sum_cov2 - jnp.sum(var * var)) * inv_d
            return var_loss, cov_loss

        x_vl, x_cl = var_and_cov_loss(xs[...], xg[...])
        y_vl, y_cl = var_and_cov_loss(ys[...], yg[...])

        sim = jnp.sum(ssd[...], keepdims=True) * (inv_n * inv_d)       # (1, 1)
        total = (jnp.float32(sim_w) * sim
                 + jnp.float32(var_w) * (x_vl + y_vl)
                 + jnp.float32(cov_w) * (x_cl + y_cl))
        loss_ref[...] = total
        # sum(x) for the torch non-finite fallback, free from the column sums.
        xsum_ref[...] = jnp.sum(xs[...], keepdims=True)


def _pick_block_n(n, d, itemsize, vmem_cap):
    """Largest multiple-of-8 N-tile that divides N and whose double-buffered
    input tiles fit the per-chip VMEM budget next to the (D,D) accumulators."""
    gram_bytes = 2 * d * d * 4
    temp_bytes = 3 * d * d * 4          # finalize temporaries headroom
    accum_bytes = 3 * 8 * d * 4
    avail = vmem_cap - gram_bytes - temp_bytes - accum_bytes - (4 << 20)
    per_tile = max(min(4 << 20, avail // 4), 64 * 1024)  # 2 inputs x 2 buffers
    budget_rows = max(8, per_tile // max(d * itemsize, 1))
    budget_rows = min(budget_rows, n)
    tn = (budget_rows // 8) * 8
    while tn >= 8:
        if n % tn == 0:
            return tn
        tn -= 8
    return n  # N < 8 or no multiple-of-8 divisor: single full-slab block


def vicreg_loss(x, y, *, similarity_weight=25.0, variance_weight=25.0,
                covariance_weight=1.0, eps=1e-4, block_n=None):
    """Pallas implementation of VicRegLoss.forward(x, y) -> scalar."""
    d = x.shape[-1]
    assert y.shape[-1] == d, "x and y must share the same feature dimension"
    x2 = x.reshape(-1, d)
    y2 = y.reshape(-1, d)
    n = x2.shape[0]
    assert y2.shape[0] == n, "x and y must flatten to the same number of rows"

    itemsize = jnp.dtype(x2.dtype).itemsize
    try:
        vmem_cap = int(pltpu.get_tpu_info().vmem_capacity_bytes)
    except Exception:
        vmem_cap = 64 << 20   # conservative default (v7x per-TC VMEM)

    if (block_n is None or n % block_n != 0
            or (block_n % 8 != 0 and block_n != n)):
        block_n = _pick_block_n(n, d, itemsize, vmem_cap)
    grid = (n // block_n,)

    # Explicit scoped-VMEM limit from the actual footprint (+ margin).
    in_bytes = 2 * 2 * block_n * d * itemsize            # 2 inputs x 2 buffers
    scratch_bytes = 2 * d * d * 4 + 3 * 8 * d * 4 + 2 * 4
    temp_bytes = 3 * d * d * 4                            # finalize temporaries
    vmem_needed = in_bytes + scratch_bytes + temp_bytes + (2 << 20)
    vmem_limit = int(min(vmem_cap, max(vmem_needed, 32 << 20)))

    kernel = functools.partial(
        _vicreg_kernel, n=n, d=d, tn=block_n,
        sim_w=float(similarity_weight), var_w=float(variance_weight),
        cov_w=float(covariance_weight), eps=float(eps))

    grid_spec = pltpu.PrefetchScalarGridSpec(
        num_scalar_prefetch=0,
        grid=grid,
        in_specs=[
            pl.BlockSpec((block_n, d), lambda i: (i, 0)),
            pl.BlockSpec((block_n, d), lambda i: (i, 0)),
        ],
        out_specs=[
            pl.BlockSpec((1, 1), lambda i: (0, 0)),
            pl.BlockSpec((1, 1), lambda i: (0, 0)),
        ],
        scratch_shapes=[
            pltpu.VMEM((8, d), jnp.float32),   # per-sublane partial sum(x)
            pltpu.VMEM((d, d), jnp.float32),   # x^T x (f32 accumulation)
            pltpu.VMEM((8, d), jnp.float32),   # per-sublane partial sum(y)
            pltpu.VMEM((d, d), jnp.float32),   # y^T y
            pltpu.VMEM((8, d), jnp.float32),   # per-column sum((x-y)^2)
        ],
    )

    loss, xsum = pl.pallas_call(
        kernel,
        out_shape=(jax.ShapeDtypeStruct((1, 1), jnp.float32),
                   jax.ShapeDtypeStruct((1, 1), jnp.float32)),
        grid_spec=grid_spec,
        compiler_params=pltpu.CompilerParams(
            dimension_semantics=("arbitrary",),
            vmem_limit_bytes=vmem_limit),
    )(x2, y2)

    total = loss[0, 0]
    # Match torch's non-finite fallback: total = x.sum() * 0
    return jnp.where(jnp.isfinite(total), total, xsum[0, 0] * 0.0)


if __name__ == "__main__":
    key = jax.random.PRNGKey(0)
    kx, ky = jax.random.split(key)
    # (batch=2, seq=8, hidden=32) -> flattened internally to (N=16, D=32)
    x = jax.random.normal(kx, (2, 8, 32), dtype=jnp.float32)
    y = jax.random.normal(ky, (2, 8, 32), dtype=jnp.float32)

    # pure-JAX reference of the torch semantics
    def _ref(x, y, eps=1e-4):
        x = x.reshape(-1, x.shape[-1]); y = y.reshape(-1, y.shape[-1])
        n, d = x.shape
        sim = jnp.mean((x - y) ** 2)
        def var_l(z):
            v = jnp.var(z, axis=0, ddof=1)
            return jnp.mean(jnp.maximum(1.0 - jnp.sqrt(v + eps), 0.0))
        def cov_l(z):
            zc = z - z.mean(axis=0)
            cov = zc.T @ zc / (n - 1)
            off = cov - jnp.diag(jnp.diag(cov))
            return jnp.sum(off ** 2) / d
        return 25.0 * sim + 25.0 * (var_l(x) + var_l(y)) + 1.0 * (cov_l(x) + cov_l(y))

    ref = _ref(x, y)

    # block_n=8 -> grid=(2,): exercises the streamed multi-tile reduction path.
    loss = vicreg_loss(x, y, block_n=8)
    jax.block_until_ready(loss)
    assert jnp.allclose(loss, ref, rtol=1e-4, atol=1e-4), (loss, ref)

    # default path: auto-picked tile (single slab here), auto VMEM budget.
    loss2 = vicreg_loss(x, y)
    jax.block_until_ready(loss2)
    assert jnp.allclose(loss2, ref, rtol=1e-4, atol=1e-4), (loss2, ref)

    print("KERNEL_OK")
</pallas_src>

<mosaic_0001>
module attributes {stable_mosaic.version = 11 : i64} {
  func.func @_vicreg_kernel(%arg0: i32, %arg1: memref<8x32xf32, #tpu.memory_space<vmem>>, %arg2: memref<8x32xf32, #tpu.memory_space<vmem>>, %arg3: memref<1x1xf32, #tpu.memory_space<vmem>>, %arg4: memref<1x1xf32, #tpu.memory_space<vmem>>, %arg5: memref<8x32xf32, #tpu.memory_space<vmem>>, %arg6: memref<32x32xf32, #tpu.memory_space<vmem>>, %arg7: memref<8x32xf32, #tpu.memory_space<vmem>>, %arg8: memref<32x32xf32, #tpu.memory_space<vmem>>, %arg9: memref<8x32xf32, #tpu.memory_space<vmem>>) attributes {dimension_semantics = [#tpu.dimension_semantics<arbitrary>], iteration_bounds = array<i64: 2>, scalar_prefetch = 0 : i64, scratch_operands = 5 : i64, tpu.core_type = #tpu.core_type<tc>, window_params = [{transform_indices = @transform_0, window_bounds = array<i64: 8, 32>}, {transform_indices = @transform_1, window_bounds = array<i64: 8, 32>}, {pipeline_mode = #tpu.pipeline_mode<synchronous>, transform_indices = @transform_2, window_bounds = array<i64: 1, 1>}, {pipeline_mode = #tpu.pipeline_mode<synchronous>, transform_indices = @transform_3, window_bounds = array<i64: 1, 1>}]} {
    %c0_i32 = arith.constant 0 : i32
    %0 = arith.cmpi eq, %arg0, %c0_i32 : i32
    %1 = arith.extui %0 : i1 to i32
    %c0_i32_0 = arith.constant 0 : i32
    %2 = arith.cmpi ne, %1, %c0_i32_0 : i32
    scf.if %2 {
      %cst_29 = arith.constant 0.000000e+00 : f32
      %33 = vector.broadcast %cst_29 : f32 to vector<8x32xf32>
      %c0_30 = arith.constant 0 : index
      %c0_31 = arith.constant 0 : index
      %34 = vector.load %arg5[%c0_30, %c0_31] : memref<8x32xf32, #tpu.memory_space<vmem>>, vector<8x32xf32>
      tpu.vector_store %arg5[%c0_30, %c0_31], %33 {strides = array<i32>} : memref<8x32xf32, #tpu.memory_space<vmem>>, vector<8x32xf32>,
      %cst_32 = arith.constant 0.000000e+00 : f32
      %35 = vector.broadcast %cst_32 : f32 to vector<32x32xf32>
      %c0_33 = arith.constant 0 : index
      %c0_34 = arith.constant 0 : index
      %36 = vector.load %arg6[%c0_33, %c0_34] : memref<32x32xf32, #tpu.memory_space<vmem>>, vector<32x32xf32>
      tpu.vector_store %arg6[%c0_33, %c0_34], %35 {strides = array<i32>} : memref<32x32xf32, #tpu.memory_space<vmem>>, vector<32x32xf32>,
      %cst_35 = arith.constant 0.000000e+00 : f32
      %37 = vector.broadcast %cst_35 : f32 to vector<8x32xf32>
      %c0_36 = arith.constant 0 : index
      %c0_37 = arith.constant 0 : index
      %38 = vector.load %arg7[%c0_36, %c0_37] : memref<8x32xf32, #tpu.memory_space<vmem>>, vector<8x32xf32>
      tpu.vector_store %arg7[%c0_36, %c0_37], %37 {strides = array<i32>} : memref<8x32xf32, #tpu.memory_space<vmem>>, vector<8x32xf32>,
      %cst_38 = arith.constant 0.000000e+00 : f32
      %39 = vector.broadcast %cst_38 : f32 to vector<32x32xf32>
      %c0_39 = arith.constant 0 : index
      %c0_40 = arith.constant 0 : index
      %40 = vector.load %arg8[%c0_39, %c0_40] : memref<32x32xf32, #tpu.memory_space<vmem>>, vector<32x32xf32>
      tpu.vector_store %arg8[%c0_39, %c0_40], %39 {strides = array<i32>} : memref<32x32xf32, #tpu.memory_space<vmem>>, vector<32x32xf32>,
      %cst_41 = arith.constant 0.000000e+00 : f32
      %41 = vector.broadcast %cst_41 : f32 to vector<8x32xf32>
      %c0_42 = arith.constant 0 : index
      %c0_43 = arith.constant 0 : index
      %42 = vector.load %arg9[%c0_42, %c0_43] : memref<8x32xf32, #tpu.memory_space<vmem>>, vector<8x32xf32>
      tpu.vector_store %arg9[%c0_42, %c0_43], %41 {strides = array<i32>} : memref<8x32xf32, #tpu.memory_space<vmem>>, vector<8x32xf32>,
    } else {
    }
    %c0 = arith.constant 0 : index
    %c0_1 = arith.constant 0 : index
    %3 = vector.load %arg1[%c0, %c0_1] : memref<8x32xf32, #tpu.memory_space<vmem>>, vector<8x32xf32>
    %c0_2 = arith.constant 0 : index
    %c0_3 = arith.constant 0 : index
    %4 = vector.load %arg2[%c0_2, %c0_3] : memref<8x32xf32, #tpu.memory_space<vmem>>, vector<8x32xf32>
    %c0_4 = arith.constant 0 : index
    %c0_5 = arith.constant 0 : index
    %5 = vector.load %arg6[%c0_4, %c0_5] : memref<32x32xf32, #tpu.memory_space<vmem>>, vector<32x32xf32>
    %cst = arith.constant dense<0.000000e+00> : vector<32x32xf32>
    %6 = tpu.matmul %3, %3, %cst {dimension_numbers = #tpu.dot_dimension_numbers<[0], [0], [1], [1], [0, 1, 1, 1], [], []>} : vector<8x32xf32>, vector<8x32xf32>, vector<32x32xf32> -> vector<32x32xf32>
    %7 = arith.addf %5, %6 : vector<32x32xf32>
    %c0_6 = arith.constant 0 : index
    %c0_7 = arith.constant 0 : index
    %8 = vector.load %arg6[%c0_6, %c0_7] : memref<32x32xf32, #tpu.memory_space<vmem>>, vector<32x32xf32>
    tpu.vector_store %arg6[%c0_6, %c0_7], %7 {strides = array<i32>} : memref<32x32xf32, #tpu.memory_space<vmem>>, vector<32x32xf32>,
    %c0_8 = arith.constant 0 : index
    %c0_9 = arith.constant 0 : index
    %9 = vector.load %arg8[%c0_8, %c0_9] : memref<32x32xf32, #tpu.memory_space<vmem>>, vector<32x32xf32>
    %cst_10 = arith.constant dense<0.000000e+00> : vector<32x32xf32>
    %10 = tpu.matmul %4, %4, %cst_10 {dimension_numbers = #tpu.dot_dimension_numbers<[0], [0], [1], [1], [0, 1, 1, 1], [], []>} : vector<8x32xf32>, vector<8x32xf32>, vector<32x32xf32> -> vector<32x32xf32>
    %11 = arith.addf %9, %10 : vector<32x32xf32>
    %c0_11 = arith.constant 0 : index
    %c0_12 = arith.constant 0 : index
    %12 = vector.load %arg8[%c0_11, %c0_12] : memref<32x32xf32, #tpu.memory_space<vmem>>, vector<32x32xf32>
    tpu.vector_store %arg8[%c0_11, %c0_12], %11 {strides = array<i32>} : memref<32x32xf32, #tpu.memory_space<vmem>>, vector<32x32xf32>,
    %13 = arith.subf %3, %4 : vector<8x32xf32>
    %14 = arith.mulf %13, %13 : vector<8x32xf32>
    %c0_13 = arith.constant 0 : index
    %c0_14 = arith.constant 0 : index
    %15 = vector.load %arg5[%c0_13, %c0_14] : memref<8x32xf32, #tpu.memory_space<vmem>>, vector<8x32xf32>
    %16 = vector.shape_cast %3 : vector<8x32xf32> to vector<1x8x32xf32>
    %cst_15 = arith.constant dense<0.000000e+00> : vector<8x32xf32>
    %17 = vector.multi_reduction <add>, %16, %cst_15 [0] : vector<1x8x32xf32> to vector<8x32xf32>
    %18 = arith.addf %15, %17 : vector<8x32xf32>
    %c0_16 = arith.constant 0 : index
    %c0_17 = arith.constant 0 : index
    %19 = vector.load %arg5[%c0_16, %c0_17] : memref<8x32xf32, #tpu.memory_space<vmem>>, vector<8x32xf32>
    tpu.vector_store %arg5[%c0_16, %c0_17], %18 {strides = array<i32>} : memref<8x32xf32, #tpu.memory_space<vmem>>, vector<8x32xf32>,
    %c0_18 = arith.constant 0 : index
    %c0_19 = arith.constant 0 : index
    %20 = vector.load %arg7[%c0_18, %c0_19] : memref<8x32xf32, #tpu.memory_space<vmem>>, vector<8x32xf32>
    %21 = vector.shape_cast %4 : vector<8x32xf32> to vector<1x8x32xf32>
    %cst_20 = arith.constant dense<0.000000e+00> : vector<8x32xf32>
    %22 = vector.multi_reduction <add>, %21, %cst_20 [0] : vector<1x8x32xf32> to vector<8x32xf32>
    %23 = arith.addf %20, %22 : vector<8x32xf32>
    %c0_21 = arith.constant 0 : index
    %c0_22 = arith.constant 0 : index
    %24 = vector.load %arg7[%c0_21, %c0_22] : memref<8x32xf32, #tpu.memory_space<vmem>>, vector<8x32xf32>
    tpu.vector_store %arg7[%c0_21, %c0_22], %23 {strides = array<i32>} : memref<8x32xf32, #tpu.memory_space<vmem>>, vector<8x32xf32>,
    %c0_23 = arith.constant 0 : index
    %c0_24 = arith.constant 0 : index
    %25 = vector.load %arg9[%c0_23, %c0_24] : memref<8x32xf32, #tpu.memory_space<vmem>>, vector<8x32xf32>
    %26 = vector.shape_cast %14 : vector<8x32xf32> to vector<1x8x32xf32>
    %cst_25 = arith.constant dense<0.000000e+00> : vector<8x32xf32>
    %27 = vector.multi_reduction <add>, %26, %cst_25 [0] : vector<1x8x32xf32> to vector<8x32xf32>
    %28 = arith.addf %25, %27 : vector<8x32xf32>
    %c0_26 = arith.constant 0 : index
    %c0_27 = arith.constant 0 : index
    %29 = vector.load %arg9[%c0_26, %c0_27] : memref<8x32xf32, #tpu.memory_space<vmem>>, vector<8x32xf32>
    tpu.vector_store %arg9[%c0_26, %c0_27], %28 {strides = array<i32>} : memref<8x32xf32, #tpu.memory_space<vmem>>, vector<8x32xf32>,
    %c1_i32 = arith.constant 1 : i32
    %30 = arith.cmpi eq, %arg0, %c1_i32 : i32
    %31 = arith.extui %30 : i1 to i32
    %c0_i32_28 = arith.constant 0 : i32
    %32 = arith.cmpi ne, %31, %c0_i32_28 : i32
    scf.if %32 {
      %33 = tpu.iota {dimensions = array<i32: 0>} : vector<32x32xi32>
      %34 = tpu.iota {dimensions = array<i32: 1>} : vector<32x32xi32>
      %35 = arith.cmpi eq, %33, %34 : vector<32x32xi32>
      %c0_29 = arith.constant 0 : index
      %c0_30 = arith.constant 0 : index
      %36 = vector.load %arg5[%c0_29, %c0_30] : memref<8x32xf32, #tpu.memory_space<vmem>>, vector<8x32xf32>
      %c0_31 = arith.constant 0 : index
      %c0_32 = arith.constant 0 : index
      %37 = vector.load %arg6[%c0_31, %c0_32] : memref<32x32xf32, #tpu.memory_space<vmem>>, vector<32x32xf32>
      %cst_33 = arith.constant dense<0.000000e+00> : vector<32xf32>
      %38 = vector.multi_reduction <add>, %36, %cst_33 [0] : vector<8x32xf32> to vector<32xf32>
      %39 = vector.shape_cast %38 : vector<32xf32> to vector<1x32xf32>
      %cst_34 = arith.constant 6.250000e-02 : f32
      %40 = vector.broadcast %cst_34 : f32 to vector<1x32xf32>
      %41 = arith.mulf %39, %40 : vector<1x32xf32>
      %cst_35 = arith.constant 0.000000e+00 : f32
      %42 = vector.broadcast %cst_35 : f32 to vector<32x32xf32>
      %43 = arith.select %35, %37, %42 : vector<32x32xi1>, vector<32x32xf32>
      %cst_36 = arith.constant dense<0.000000e+00> : vector<32xf32>
      %44 = vector.multi_reduction <add>, %43, %cst_36 [0] : vector<32x32xf32> to vector<32xf32>
      %45 = vector.shape_cast %44 : vector<32xf32> to vector<1x32xf32>
      %cst_37 = arith.constant 1.600000e+01 : f32
      %46 = vector.broadcast %cst_37 : f32 to vector<1x32xf32>
      %47 = arith.mulf %46, %41 : vector<1x32xf32>
      %48 = arith.mulf %47, %41 : vector<1x32xf32>
      %49 = arith.subf %45, %48 : vector<1x32xf32>
      %cst_38 = arith.constant 0.0666666701 : f32
      %50 = vector.broadcast %cst_38 : f32 to vector<1x32xf32>
      %51 = arith.mulf %49, %50 : vector<1x32xf32>
      %cst_39 = arith.constant 9.99999974E-5 : f32
      %52 = vector.broadcast %cst_39 : f32 to vector<1x32xf32>
      %53 = arith.addf %51, %52 : vector<1x32xf32>
      %54 = math.sqrt %53 : vector<1x32xf32>
      %cst_40 = arith.constant 1.000000e+00 : f32
      %55 = vector.broadcast %cst_40 : f32 to vector<1x32xf32>
      %56 = arith.subf %55, %54 : vector<1x32xf32>
      %cst_41 = arith.constant 0.000000e+00 : f32
      %57 = vector.broadcast %cst_41 : f32 to vector<1x32xf32>
      %58 = arith.maximumf %56, %57 : vector<1x32xf32>
      %59 = vector.shape_cast %58 : vector<1x32xf32> to vector<1x1x32xf32>
      %cst_42 = arith.constant dense<0.000000e+00> : vector<1xf32>
      %60 = vector.multi_reduction <add>, %59, %cst_42 [1, 2] : vector<1x1x32xf32> to vector<1xf32>
      %61 = vector.shape_cast %60 : vector<1xf32> to vector<1x1x1xf32>
      %62 = vector.extract %61[0, 0, 0] : f32 from vector<1x1x1xf32>
      %cst_43 = arith.constant 3.125000e-02 : f32
      %63 = arith.mulf %62, %cst_43 : f32
      %64 = arith.mulf %37, %37 : vector<32x32xf32>
      %65 = vector.shape_cast %64 : vector<32x32xf32> to vector<1x32x32xf32>
      %cst_44 = arith.constant dense<0.000000e+00> : vector<1xf32>
      %66 = vector.multi_reduction <add>, %65, %cst_44 [1, 2] : vector<1x32x32xf32> to vector<1xf32>
      %67 = vector.shape_cast %66 : vector<1xf32> to vector<1x1x1xf32>
      %68 = vector.extract %67[0, 0, 0] : f32 from vector<1x1x1xf32>
      %cst_45 = arith.constant dense<0.000000e+00> : vector<1x32xf32>
      %69 = tpu.matmul %41, %37, %cst_45 {dimension_numbers = #tpu.dot_dimension_numbers<[1], [0], [0], [1], [0, 0, 1, 1], [], []>} : vector<1x32xf32>, vector<32x32xf32>, vector<1x32xf32> -> vector<1x32xf32>
      %70 = arith.mulf %69, %41 : vector<1x32xf32>
      %71 = vector.shape_cast %70 : vector<1x32xf32> to vector<1x1x32xf32>
      %cst_46 = arith.constant dense<0.000000e+00> : vector<1xf32>
      %72 = vector.multi_reduction <add>, %71, %cst_46 [1, 2] : vector<1x1x32xf32> to vector<1xf32>
      %73 = vector.shape_cast %72 : vector<1xf32> to vector<1x1x1xf32>
      %74 = vector.extract %73[0, 0, 0] : f32 from vector<1x1x1xf32>
      %75 = arith.mulf %41, %41 : vector<1x32xf32>
      %76 = vector.shape_cast %75 : vector<1x32xf32> to vector<1x1x32xf32>
      %cst_47 = arith.constant dense<0.000000e+00> : vector<1xf32>
      %77 = vector.multi_reduction <add>, %76, %cst_47 [1, 2] : vector<1x1x32xf32> to vector<1xf32>
      %78 = vector.shape_cast %77 : vector<1xf32> to vector<1x1x1xf32>
      %79 = vector.extract %78[0, 0, 0] : f32 from vector<1x1x1xf32>
      %cst_48 = arith.constant 2.000000e+00 : f32
      %cst_49 = arith.constant 1.600000e+01 : f32
      %80 = arith.mulf %cst_48, %cst_49 : f32
      %81 = arith.mulf %80, %74 : f32
      %82 = arith.subf %68, %81 : f32
      %cst_50 = arith.constant 1.600000e+01 : f32
      %83 = arith.mulf %cst_50, %79 : f32
      %cst_51 = arith.constant 1.600000e+01 : f32
      %84 = arith.mulf %cst_51, %79 : f32
      %85 = arith.mulf %83, %84 : f32
      %86 = arith.addf %82, %85 : f32
      %cst_52 = arith.constant 0.0666666701 : f32
      %cst_53 = arith.constant 0.0666666701 : f32
      %87 = arith.mulf %cst_52, %cst_53 : f32
      %88 = arith.mulf %86, %87 : f32
      %89 = arith.mulf %51, %51 : vector<1x32xf32>
      %90 = vector.shape_cast %89 : vector<1x32xf32> to vector<1x1x32xf32>
      %cst_54 = arith.constant dense<0.000000e+00> : vector<1xf32>
      %91 = vector.multi_reduction <add>, %90, %cst_54 [1, 2] : vector<1x1x32xf32> to vector<1xf32>
      %92 = vector.shape_cast %91 : vector<1xf32> to vector<1x1x1xf32>
      %93 = vector.extract %92[0, 0, 0] : f32 from vector<1x1x1xf32>
      %94 = arith.subf %88, %93 : f32
      %cst_55 = arith.constant 3.125000e-02 : f32
      %95 = arith.mulf %94, %cst_55 : f32
      %c0_56 = arith.constant 0 : index
      %c0_57 = arith.constant 0 : index
      %96 = vector.load %arg7[%c0_56, %c0_57] : memref<8x32xf32, #tpu.memory_space<vmem>>, vector<8x32xf32>
      %c0_58 = arith.constant 0 : index
      %c0_59 = arith.constant 0 : index
      %97 = vector.load %arg8[%c0_58, %c0_59] : memref<32x32xf32, #tpu.memory_space<vmem>>, vector<32x32xf32>
      %cst_60 = arith.constant dense<0.000000e+00> : vector<32xf32>
      %98 = vector.multi_reduction <add>, %96, %cst_60 [0] : vector<8x32xf32> to vector<32xf32>
      %99 = vector.shape_cast %98 : vector<32xf32> to vector<1x32xf32>
      %cst_61 = arith.constant 6.250000e-02 : f32
      %100 = vector.broadcast %cst_61 : f32 to vector<1x32xf32>
      %101 = arith.mulf %99, %100 : vector<1x32xf32>
      %cst_62 = arith.constant 0.000000e+00 : f32
      %102 = vector.broadcast %cst_62 : f32 to vector<32x32xf32>
      %103 = arith.select %35, %97, %102 : vector<32x32xi1>, vector<32x32xf32>
      %cst_63 = arith.constant dense<0.000000e+00> : vector<32xf32>
      %104 = vector.multi_reduction <add>, %103, %cst_63 [0] : vector<32x32xf32> to vector<32xf32>
      %105 = vector.shape_cast %104 : vector<32xf32> to vector<1x32xf32>
      %cst_64 = arith.constant 1.600000e+01 : f32
      %106 = vector.broadcast %cst_64 : f32 to vector<1x32xf32>
      %107 = arith.mulf %106, %101 : vector<1x32xf32>
      %108 = arith.mulf %107, %101 : vector<1x32xf32>
      %109 = arith.subf %105, %108 : vector<1x32xf32>
      %cst_65 = arith.constant 0.0666666701 : f32
      %110 = vector.broadcast %cst_65 : f32 to vector<1x32xf32>
      %111 = arith.mulf %109, %110 : vector<1x32xf32>
      %cst_66 = arith.constant 9.99999974E-5 : f32
      %112 = vector.broadcast %cst_66 : f32 to vector<1x32xf32>
      %113 = arith.addf %111, %112 : vector<1x32xf32>
      %114 = math.sqrt %113 : vector<1x32xf32>
      %cst_67 = arith.constant 1.000000e+00 : f32
      %115 = vector.broadcast %cst_67 : f32 to vector<1x32xf32>
      %116 = arith.subf %115, %114 : vector<1x32xf32>
      %cst_68 = arith.constant 0.000000e+00 : f32
      %117 = vector.broadcast %cst_68 : f32 to vector<1x32xf32>
      %118 = arith.maximumf %116, %117 : vector<1x32xf32>
      %119 = vector.shape_cast %118 : vector<1x32xf32> to vector<1x1x32xf32>
      %cst_69 = arith.constant dense<0.000000e+00> : vector<1xf32>
      %120 = vector.multi_reduction <add>, %119, %cst_69 [1, 2] : vector<1x1x32xf32> to vector<1xf32>
      %121 = vector.shape_cast %120 : vector<1xf32> to vector<1x1x1xf32>
      %122 = vector.extract %121[0, 0, 0] : f32 from vector<1x1x1xf32>
      %cst_70 = arith.constant 3.125000e-02 : f32
      %123 = arith.mulf %122, %cst_70 : f32
      %124 = arith.mulf %97, %97 : vector<32x32xf32>
      %125 = vector.shape_cast %124 : vector<32x32xf32> to vector<1x32x32xf32>
      %cst_71 = arith.constant dense<0.000000e+00> : vector<1xf32>
      %126 = vector.multi_reduction <add>, %125, %cst_71 [1, 2] : vector<1x32x32xf32> to vector<1xf32>
      %127 = vector.shape_cast %126 : vector<1xf32> to vector<1x1x1xf32>
      %128 = vector.extract %127[0, 0, 0] : f32 from vector<1x1x1xf32>
      %cst_72 = arith.constant dense<0.000000e+00> : vector<1x32xf32>
      %129 = tpu.matmul %101, %97, %cst_72 {dimension_numbers = #tpu.dot_dimension_numbers<[1], [0], [0], [1], [0, 0, 1, 1], [], []>} : vector<1x32xf32>, vector<32x32xf32>, vector<1x32xf32> -> vector<1x32xf32>
      %130 = arith.mulf %129, %101 : vector<1x32xf32>
      %131 = vector.shape_cast %130 : vector<1x32xf32> to vector<1x1x32xf32>
      %cst_73 = arith.constant dense<0.000000e+00> : vector<1xf32>
      %132 = vector.multi_reduction <add>, %131, %cst_73 [1, 2] : vector<1x1x32xf32> to vector<1xf32>
      %133 = vector.shape_cast %132 : vector<1xf32> to vector<1x1x1xf32>
      %134 = vector.extract %133[0, 0, 0] : f32 from vector<1x1x1xf32>
      %135 = arith.mulf %101, %101 : vector<1x32xf32>
      %136 = vector.shape_cast %135 : vector<1x32xf32> to vector<1x1x32xf32>
      %cst_74 = arith.constant dense<0.000000e+00> : vector<1xf32>
      %137 = vector.multi_reduction <add>, %136, %cst_74 [1, 2] : vector<1x1x32xf32> to vector<1xf32>
      %138 = vector.shape_cast %137 : vector<1xf32> to vector<1x1x1xf32>
      %139 = vector.extract %138[0, 0, 0] : f32 from vector<1x1x1xf32>
      %cst_75 = arith.constant 2.000000e+00 : f32
      %cst_76 = arith.constant 1.600000e+01 : f32
      %140 = arith.mulf %cst_75, %cst_76 : f32
      %141 = arith.mulf %140, %134 : f32
      %142 = arith.subf %128, %141 : f32
      %cst_77 = arith.constant 1.600000e+01 : f32
      %143 = arith.mulf %cst_77, %139 : f32
      %cst_78 = arith.constant 1.600000e+01 : f32
      %144 = arith.mulf %cst_78, %139 : f32
      %145 = arith.mulf %143, %144 : f32
      %146 = arith.addf %142, %145 : f32
      %cst_79 = arith.constant 0.0666666701 : f32
      %cst_80 = arith.constant 0.0666666701 : f32
      %147 = arith.mulf %cst_79, %cst_80 : f32
      %148 = arith.mulf %146, %147 : f32
      %149 = arith.mulf %111, %111 : vector<1x32xf32>
      %150 = vector.shape_cast %149 : vector<1x32xf32> to vector<1x1x32xf32>
      %cst_81 = arith.constant dense<0.000000e+00> : vector<1xf32>
      %151 = vector.multi_reduction <add>, %150, %cst_81 [1, 2] : vector<1x1x32xf32> to vector<1xf32>
      %152 = vector.shape_cast %151 : vector<1xf32> to vector<1x1x1xf32>
      %153 = vector.extract %152[0, 0, 0] : f32 from vector<1x1x1xf32>
      %154 = arith.subf %148, %153 : f32
      %cst_82 = arith.constant 3.125000e-02 : f32
      %155 = arith.mulf %154, %cst_82 : f32
      %c0_83 = arith.constant 0 : index
      %c0_84 = arith.constant 0 : index
      %156 = vector.load %arg9[%c0_83, %c0_84] : memref<8x32xf32, #tpu.memory_space<vmem>>, vector<8x32xf32>
      %157 = vector.shape_cast %156 : vector<8x32xf32> to vector<1x8x32xf32>
      %cst_85 = arith.constant dense<0.000000e+00> : vector<1xf32>
      %158 = vector.multi_reduction <add>, %157, %cst_85 [1, 2] : vector<1x8x32xf32> to vector<1xf32>
      %159 = vector.shape_cast %158 : vector<1xf32> to vector<1x1x1xf32>
      %160 = vector.extract %159[0, 0, 0] : f32 from vector<1x1x1xf32>
      %161 = vector.broadcast %160 : f32 to vector<1x1xf32>
      %cst_86 = arith.constant 6.250000e-02 : f32
      %cst_87 = arith.constant 3.125000e-02 : f32
      %162 = arith.mulf %cst_86, %cst_87 : f32
      %163 = vector.broadcast %162 : f32 to vector<1x1xf32>
      %164 = arith.mulf %161, %163 : vector<1x1xf32>
      %cst_88 = arith.constant 2.500000e+01 : f32
      %165 = vector.broadcast %cst_88 : f32 to vector<1x1xf32>
      %166 = arith.mulf %165, %164 : vector<1x1xf32>
      %167 = arith.addf %63, %123 : f32
      %cst_89 = arith.constant 2.500000e+01 : f32
      %168 = arith.mulf %cst_89, %167 : f32
      %169 = vector.broadcast %168 : f32 to vector<1x1xf32>
      %170 = arith.addf %166, %169 : vector<1x1xf32>
      %171 = arith.addf %95, %155 : f32
      %cst_90 = arith.constant 1.000000e+00 : f32
      %172 = arith.mulf %cst_90, %171 : f32
      %173 = vector.broadcast %172 : f32 to vector<1x1xf32>
      %174 = arith.addf %170, %173 : vector<1x1xf32>
      %c0_91 = arith.constant 0 : index
      %c0_92 = arith.constant 0 : index
      %175 = vector.load %arg3[%c0_91, %c0_92] : memref<1x1xf32, #tpu.memory_space<vmem>>, vector<1x1xf32>
      tpu.vector_store %arg3[%c0_91, %c0_92], %174 {strides = array<i32>} : memref<1x1xf32, #tpu.memory_space<vmem>>, vector<1x1xf32>,
      %c0_93 = arith.constant 0 : index
      %c0_94 = arith.constant 0 : index
      %176 = vector.load %arg5[%c0_93, %c0_94] : memref<8x32xf32, #tpu.memory_space<vmem>>, vector<8x32xf32>
      %177 = vector.shape_cast %176 : vector<8x32xf32> to vector<1x8x32xf32>
      %cst_95 = arith.constant dense<0.000000e+00> : vector<1xf32>
      %178 = vector.multi_reduction <add>, %177, %cst_95 [1, 2] : vector<1x8x32xf32> to vector<1xf32>
      %179 = vector.shape_cast %178 : vector<1xf32> to vector<1x1x1xf32>
      %180 = vector.extract %179[0, 0, 0] : f32 from vector<1x1x1xf32>
      %181 = vector.broadcast %180 : f32 to vector<1x1xf32>
      %c0_96 = arith.constant 0 : index
      %c0_97 = arith.constant 0 : index
      %182 = vector.load %arg4[%c0_96, %c0_97] : memref<1x1xf32, #tpu.memory_space<vmem>>, vector<1x1xf32>
      tpu.vector_store %arg4[%c0_96, %c0_97], %181 {strides = array<i32>} : memref<1x1xf32, #tpu.memory_space<vmem>>, vector<1x1xf32>,
    } else {
    }
    return
  }
  func.func @transform_0(%arg0: i32) -> (i32, i32) {
    %c0_i32 = arith.constant 0 : i32
    %c0_i32_0 = arith.constant 0 : i32
    return %arg0, %c0_i32 : i32, i32
  }
  func.func @transform_1(%arg0: i32) -> (i32, i32) {
    %c0_i32 = arith.constant 0 : i32
    %c0_i32_0 = arith.constant 0 : i32
    return %arg0, %c0_i32 : i32, i32
  }
  func.func @transform_2(%arg0: i32) -> (i32, i32) {
    %c0_i32 = arith.constant 0 : i32
    %c0_i32_0 = arith.constant 0 : i32
    %c0_i32_1 = arith.constant 0 : i32
    return %c0_i32, %c0_i32_0 : i32, i32
  }
  func.func @transform_3(%arg0: i32) -> (i32, i32) {
    %c0_i32 = arith.constant 0 : i32
    %c0_i32_0 = arith.constant 0 : i32
    %c0_i32_1 = arith.constant 0 : i32
    return %c0_i32, %c0_i32_0 : i32, i32
  }
}

</mosaic_0001>

<bundles_post_ra>
// kernel: tpu_custom_call.1
= control target key start
LH: loop header
LB: loop body
LE: loop exit
PB: predicated region body
PF: predicated region fallthrough
CT: control target
= control target key end

     0   :  { %s1403_s0 = inlined_call_operand.hbm [shape: f32[16,32], index: 0, kind: input, shape index: {}]   ;;  %s1404_s1 = inlined_call_operand.hbm [shape: f32[16,32], index: 1, kind: input, shape index: {}]   ;;  %s1405_s2 = inlined_call_operand.hbm [shape: f32[1,1], index: 2, kind: output, shape index: {0}]   ;;  %s1406_s3 = inlined_call_operand.hbm [shape: f32[1,1], index: 3, kind: output, shape index: {1}]  }
   0x1   :  { %1407 = sst [smem:[#allocation20_spill]] %s1403_s0 }
   0x2   :  { %1408 = sst [smem:[#allocation21_spill]] %s1404_s1 }
   0x3   :  { %9 = vsyncpa [#allocation8], 0 }
   0x4   :  { %11 = vsyncpa [#allocation8 + $0x1], 0 }
   0x5   :  { %12 = vsyncpa [#allocation11], 0 }
   0x6   :  { %14 = vsyncpa [#allocation11 + $0x1], 0 }
   0x7   :  { %15 = vsyncpa [#allocation9], 0 }
   0x8   :  { %16 = vsyncpa [#allocation14], 0  ;;  %s1169_s12 = smov 0   ;;  %s1171_s13 = smov 0  }
   0x9   :  { %s1173_s14 = smov 0   ;;  %s1175_s15 = smov 0  }
   0xa LB: > { %s1188_s16 = sadd.s32 4294967295, %s1144_s15   ;;  %s1191_s17 = sadd.s32 1, %s1144_s15   ;;  %s1144_s15 = sphi %s1175_s15, %s1420_s15   ;;  %s1140_s14 = sphi %s1173_s14, %s1419_s14   ;;  %s1136_s13 = sphi %s1171_s13, %s1418_s13   ;;  %s1132_s12 = sphi %s1169_s12, %s1417_s12  }
   0xb   : > { %s26_s18 = ssub.s32 %s1144_s15, %s1191_s17  ;;  %s29_s19 = sadd.s32 1, %s1140_s14 }
   0xc   : > { %p27_p0 = scmp.eq.s32.totalorder %s26_s18, 0  ;;  %p36_p1 = scmp.ne.s32.totalorder %s1140_s14, %s1136_s13 }
   0xd   : > { %p37_p2 = scmp.eq.s32.totalorder %s1144_s15, 0  ;;  %p42_p3 = scmp.ne.s32.totalorder %s1136_s13, %s1132_s12 }
   0xe   : > { %s1201_s20 = scalar_select %p27_p0, %s1140_s14, %s29_s19  }
   0xf   : > { %p1203_p4 = por %p37_p2, %p36_p1  ;;  %p43_p5 = scmp.eq.s32.totalorder %s1188_s16, 0 }
  0x10   : > { %1409 = sst [smem:[#allocation19_spill]] %s1201_s20  ;;  %p937_p6 = scmp.lt.s32.totalorder %s1144_s15, 2 }
  0x11   : > { %p1209_p7 = por %p43_p5, %p42_p3  ;;  %s1214_s23 = sand.u32 1, %s1140_s14  }
  0x12   : > { %s867_s24 = sshll.u32 %s1214_s23, 3  ;;  %s868_s25 = sshll.u32 %s1144_s15, 3 }
  0x13   : > { %s1412_s0 = sld [smem:[#allocation20_spill]]  ;;  %s138_s29 = scalar_lea.vmem [#allocation7], %s867_s24 }
  0x14   : > { %s146_s30 = sshll.u32 %s138_s29, 4  ;;  %p1223_p8 = pnand %p937_p6, %p1203_p4  ;;  %s147_s30 = int_to_ptr.vmem [resolvable:$true] %s146_s30 }
  0x15   : > { %p871_p9 = scmp.ge.s32.totalorder %s1144_s15, 1  ;;  %p170_p10 = scmp.lt.s32.totalorder %s1144_s15, 3 }
  0x16   : > { %s135_s6 = scalar_lea.sflag [#allocation8], %s1214_s23  ;;  %p986_p12 = pneg %p1223_p8 }
  0x19   : > { %s142_s28 = scalar_lea.hbm %s1412_s0, %s868_s25  ;;  %s989_s11 = scalar_lea.hbm %s1412_s0, 16 }
  0x1a   : > { %s144_s4 = sshll.u32 %s142_s28, 4  ;;  %s145_s4 = int_to_ptr.hbm [resolvable:$true] %s144_s4 }
  0x1b   : > { %s982_s7 = sshra.s32 %s145_s4, 4  ;;  %s983_s7 = int_to_ptr.hbm [resolvable:$true] %s982_s7 }
  0x1c   : > { %s984_s8 = scalar_lea.hbm %s983_s7, 8  ;;  %p990_p1 = scmp.lt.s32.totalorder %s983_s7, %s1412_s0 }
  0x1d   : > { %p985_p11 = scmp.ne.s32.totalorder %s983_s7, %s984_s8  ;;  %p991_p2 = scmp.lt.s32.totalorder %s989_s11, %s984_s8 }
  0x1f   : > { %p987_p13 = pnand %p986_p12, %p985_p11  ;;  %p992_p3 = por %p991_p2, %p990_p1 }
  0x21   : > { %p988_p0 = pneg %p987_p13 }
  0x23   : > { %p993_p4 = pnand %p992_p3, %p988_p0 }
  0x25   : > { %996 = shalt.err (!%p993_p4)
}
  0x26   : > { %933 = dma.hbm_to_vmem [thread:$0]  (!%p1223_p8), %s145_s4, 128, %s147_s30, %s135_s6  }
  0x27   : > { %p1247_p5 = pnand %p871_p9, %p170_p10  ;;  %s1415_s1 = sld [smem:[#allocation21_spill]] }
  0x28   : > { %s157_s28 = scalar_lea.vmem [#allocation10], %s867_s24  ;;  %s154_s8 = scalar_lea.sflag [#allocation11], %s1214_s23 }
  0x29   : > { %s165_s29 = sshll.u32 %s157_s28, 4  ;;  %s166_s29 = int_to_ptr.vmem [resolvable:$true] %s165_s29 }
  0x2d   : > { %s161_s27 = scalar_lea.hbm %s1415_s1, %s868_s25  ;;  %s1019_s4 = scalar_lea.hbm %s1415_s1, 16 }
  0x2e   : > { %s163_s7 = sshll.u32 %s161_s27, 4  ;;  %s164_s7 = int_to_ptr.hbm [resolvable:$true] %s163_s7 }
  0x2f   : > { %s1012_s9 = sshra.s32 %s164_s7, 4  ;;  %s1013_s9 = int_to_ptr.hbm [resolvable:$true] %s1012_s9 }
  0x30   : > { %s1014_s10 = scalar_lea.hbm %s1013_s9, 8  ;;  %p1020_p11 = scmp.lt.s32.totalorder %s1013_s9, %s1415_s1 }
  0x31   : > { %p1015_p6 = scmp.ne.s32.totalorder %s1013_s9, %s1014_s10  ;;  %p1021_p13 = scmp.lt.s32.totalorder %s1019_s4, %s1014_s10 }
  0x33   : > { %p1017_p9 = pnand %p1015_p6, %p986_p12  ;;  %p1022_p0 = por %p1021_p13, %p1020_p11 }
  0x35   : > { %p1018_p10 = pneg %p1017_p9 }
  0x37   : > { %p1023_p1 = pnand %p1022_p0, %p1018_p10 }
  0x39   : > { %1026 = shalt.err (!%p1023_p1)
}
  0x3a   : > { %936 = dma.hbm_to_vmem [thread:$0]  (!%p1223_p8), %s164_s7, 128, %s166_s29, %s154_s8  }
  0x3b   : > { %174 = sbr.rel (%p1247_p5) target bundleno = 806 (0x326), region = 28  ;;  %s176_s23 = sand.u32 (!%p1247_p5), 1, %s1136_s13  }
  0x3c   : > { %s872_s24 = sshll.u32 (!%p1247_p5), %s176_s23, 3  ;;  %s177_s11 = scalar_lea.sflag (!%p1247_p5), [#allocation8], %s176_s23 }
  0x3d   : > { %s180_s12 = scalar_lea.vmem (!%p1247_p5), [#allocation7], %s872_s24 }
  0x40   : > { %1115 = dma.done.wait (%p1209_p7), %s177_s11, 128  }
  0x41   : > { %1117 = vsyncadd (%p1209_p7), %s177_s11, 4294967168  ;;  %s187_s18 = scalar_lea.sflag [#allocation11], %s176_s23  ;;  %s190_s21 = scalar_lea.vmem [#allocation10], %s872_s24 }
  0x42   : > { %1119 = dma.done.wait (%p1209_p7), %s187_s18, 128  }
  0x43   : > { %1121 = vsyncadd (%p1209_p7), %s187_s18, 4294967168  ;;  %p874_p8 = scmp.ne.s32.totalorder %s1188_s16, 0 }
  0x45   : > { %217 = sbr.rel (%p874_p8) target bundleno = 86 (0x56), region = 40 }
  0x4a   : > { %vm218_vm0 = vcmask 261120   ;;  %v1146_v0 = vmov 0.0  }
  0x4b   : > { %219 = vst.msk [vmem:[#allocation2] sm:$0xff] %vm218_vm0, %v1146_v0 }
  0x4c   : > { %220 = vst.msk [vmem:[#allocation3] sm:$0xff] %vm218_vm0, %v1146_v0 }
  0x4d   : > { %221 = vst.msk [vmem:[#allocation3 + $0x8] sm:$0xff] %vm218_vm0, %v1146_v0 }
  0x4e   : > { %222 = vst.msk [vmem:[#allocation3 + $0x10] sm:$0xff] %vm218_vm0, %v1146_v0 }
  0x4f   : > { %223 = vst.msk [vmem:[#allocation3 + $0x18] sm:$0xff] %vm218_vm0, %v1146_v0 }
  0x50   : > { %224 = vst.msk [vmem:[#allocation4] sm:$0xff] %vm218_vm0, %v1146_v0 }
  0x51   : > { %225 = vst.msk [vmem:[#allocation5] sm:$0xff] %vm218_vm0, %v1146_v0 }
  0x52   : > { %226 = vst.msk [vmem:[#allocation5 + $0x8] sm:$0xff] %vm218_vm0, %v1146_v0 }
  0x53   : > { %227 = vst.msk [vmem:[#allocation5 + $0x10] sm:$0xff] %vm218_vm0, %v1146_v0 }
  0x54   : > { %228 = vst.msk [vmem:[#allocation5 + $0x18] sm:$0xff] %vm218_vm0, %v1146_v0 }
  0x55   : > { %229 = vst.msk [vmem:[#allocation6] sm:$0xff] %vm218_vm0, %v1146_v0 }
  0x56 PF: > { %v230_v1 = vld [vmem:[%s180_s12] sm:$0xff]  ;;  %v231_v3 = vld [vmem:[%s190_s21] sm:$0xff]  ;;  %vm314_vm1 = vcmask 261120   ;;  %vm268_vm2 = vcmask 64512   ;;  %p883_p7 = scmp.ne.s32.totalorder %s1188_s16, 1 }
  0x57   : > { %v406_v2 = vld [vmem:[#allocation2] sm:$0xff]  ;;  %236 = vxpose.xlu0.b32.start.end [1/1] (short) (narrow) %v230_v1, 32  ;;  %v410_v5 = vld [vmem:[#allocation4] sm:$0xff]  ;;  %v404_v6 = vsub.f32 %v230_v1, %v231_v3  ;;  %296 = vmatpush.msra.mxu0 %v230_v1  ;;  %v233_v22 = vld [vmem:[#allocation3 + $0x8] sm:$0xff] }
  0x58   : > { %v408_v4 = vadd.f32 %v406_v2, %v230_v1  ;;  %v412_v7 = vadd.f32 %v410_v5, %v231_v3  ;;  %892 = vmatpush.msra.mxu2 %v230_v1  ;;  %382 = vmatpush.msra.mxu1 %v231_v3  ;;  %v232_v19 = vld [vmem:[#allocation3] sm:$0xff]  ;;  %v234_v25 = vld [vmem:[#allocation3 + $0x10] sm:$0xff]  ;;  %v235_v28 = vld [vmem:[#allocation3 + $0x18] sm:$0xff] }
  0x59   : > { %v405_v9 = vmul.f32 %v404_v6, %v404_v6  ;;  %893 = vmatpush.msra.mxu3 %v231_v3  ;;  %v319_v30 = vld [vmem:[#allocation5] sm:$0xff]  ;;  %v320_v34 = vld [vmem:[#allocation5 + $0x8] sm:$0xff] }
  0x5a   : > { %409 = vst.msk [vmem:[#allocation2] sm:$0xff] %vm314_vm1, %v408_v4  ;;  %v321_v37 = vld [vmem:[#allocation5 + $0x10] sm:$0xff] }
  0x5b   : > { %413 = vst.msk [vmem:[#allocation4] sm:$0xff] %vm314_vm1, %v412_v7  ;;  %v322_v40 = vld [vmem:[#allocation5 + $0x18] sm:$0xff] }
  0x5c   : > { %v414_v8 = vld [vmem:[#allocation6] sm:$0xff] }
  0x5d   : > { %v416_v10 = vadd.f32 %v414_v8, %v405_v9 }
  0x5f   : > { %417 = vst.msk [vmem:[#allocation6] sm:$0xff] %vm314_vm1, %v416_v10 }
  0x77   : > { %323 = vxpose.xlu0.b32.start.end [1/1] (short) (narrow) %v231_v3, 32 }
  0xfb   : > { %v252_v11 = vpop.trf.xlu0 }
  0xfc   : > { %875 = vmatmul.msk.f32.vlgmr.msra.gmra.mxu0 %vm268_vm2, %v252_v11 }
 0x103   : > { %v253_v12 = vpop.trf.xlu0 }
 0x104   : > { %876 = vmatmul.msk.f32.gmra.mxu0 %vm268_vm2, %v253_v12 }
 0x10b   : > { %v254_v13 = vpop.trf.xlu0 }
 0x10c   : > { %877 = vmatmul.msk.f32.vlgmr.msra.gmra.mxu2 %vm268_vm2, %v254_v13 }
 0x113   : > { %v255_v14 = vpop.trf.xlu0 }
 0x114   : > { %878 = vmatmul.msk.f32.gmra.mxu2 %vm268_vm2, %v255_v14 }
 0x11b   : > { %v339_v15 = vpop.trf.xlu0 }
 0x11c   : > { %879 = vmatmul.msk.f32.vlgmr.msra.gmra.mxu1 %vm268_vm2, %v339_v15 }
 0x123   : > { %v340_v16 = vpop.trf.xlu0 }
 0x124   : > { %880 = vmatmul.msk.f32.gmra.mxu1 %vm268_vm2, %v340_v16 }
 0x12b   : > { %v341_v17 = vpop.trf.xlu0 }
 0x12c   : > { %881 = vmatmul.msk.f32.vlgmr.msra.gmra.mxu3 %vm268_vm2, %v341_v17 }
 0x133   : > { %v342_v18 = vpop.trf.xlu0 }
 0x134   : > { %882 = vmatmul.msk.f32.gmra.mxu3 %vm268_vm2, %v342_v18 }
 0x179   : > { %v298_v20 = vpop.f32.mrf.mxu0 }
 0x17a   : > { %v310_v21 = vadd.f32 %v298_v20, %v232_v19 }
 0x17c   : > { %315 = vst.msk [vmem:[#allocation3] sm:$0xff] %vm314_vm1, %v310_v21 }
 0x181   : > { %v301_v23 = vpop.f32.mrf.mxu0 }
 0x182   : > { %v311_v24 = vadd.f32 %v301_v23, %v233_v22 }
 0x184   : > { %316 = vst.msk [vmem:[#allocation3 + $0x8] sm:$0xff] %vm314_vm1, %v311_v24 }
 0x18f   : > { %v304_v26 = vpop.f32.mrf.mxu2 }
 0x190   : > { %v312_v27 = vadd.f32 %v304_v26, %v234_v25 }
 0x192   : > { %317 = vst.msk [vmem:[#allocation3 + $0x10] sm:$0xff] %vm314_vm1, %v312_v27 }
 0x197   : > { %v307_v29 = vpop.f32.mrf.mxu2 }
 0x198   : > { %v313_v31 = vadd.f32 %v307_v29, %v235_v28 }
 0x199   : > { %v384_v32 = vpop.f32.mrf.mxu1 }
 0x19a   : > { %318 = vst.msk [vmem:[#allocation3 + $0x18] sm:$0xff] %vm314_vm1, %v313_v31  ;;  %v396_v33 = vadd.f32 %v384_v32, %v319_v30 }
 0x19c   : > { %400 = vst.msk [vmem:[#allocation5] sm:$0xff] %vm314_vm1, %v396_v33 }
 0x1a1   : > { %v387_v35 = vpop.f32.mrf.mxu1 }
 0x1a2   : > { %v397_v36 = vadd.f32 %v387_v35, %v320_v34 }
 0x1a4   : > { %401 = vst.msk [vmem:[#allocation5 + $0x8] sm:$0xff] %vm314_vm1, %v397_v36 }
 0x1af   : > { %v390_v38 = vpop.f32.mrf.mxu3 }
 0x1b0   : > { %v398_v39 = vadd.f32 %v390_v38, %v321_v37 }
 0x1b2   : > { %402 = vst.msk [vmem:[#allocation5 + $0x10] sm:$0xff] %vm314_vm1, %v398_v39 }
 0x1b6   : > { %421 = sbr.rel (%p883_p7) target bundleno = 796 (0x31c), region = 44 }
 0x1b7   : > { %v393_v41 = vpop.f32.mrf.mxu3 }
 0x1b8   : > { %v399_v42 = vadd.f32 %v393_v41, %v322_v40 }
 0x1ba   : > { %403 = vst.msk [vmem:[#allocation5 + $0x18] sm:$0xff] %vm314_vm1, %v399_v42 }
 0x1bb   : > { %v422_v43 = vlaneseq  ;;  %v1298_v44 = vld [vmem:[#allocation3 + $0x18] sm:$0xff]  ;;  %v436_v45 = vld [vmem:[#allocation3 + $0x10] sm:$0xff]  ;;  %v435_v46 = vld [vmem:[#allocation3 + $0x8] sm:$0xff]  ;;  %vm482_vm7 = vcmask 253952   ;;  %vm743_vm12 = vcmask 0  }
 0x1bc   : > { %529 = vmatpush.msra.mxu0 %v1298_v44  ;;  %v495_v47 = vmul.f32 %v435_v46, %v435_v46  ;;  %v434_v48 = vld [vmem:[#allocation3] sm:$0xff]  ;;  %v433_v49 = vld [vmem:[#allocation2] sm:$0xff]  ;;  %v580_v56 = vld [vmem:[#allocation5 + $0x8] sm:$0xff]  ;;  %v496_v30 = vmul.f32 %v436_v45, %v436_v45  ;;  %v497_v34 = vmul.f32 %v1298_v44, %v1298_v44 }
 0x1bd   : > { %v423_v51 = vshrl.u32 %v422_v43, 7  ;;  %v428_v52 = vand.u32 127, %v422_v43  ;;  %v494_v53 = vmul.f32 %v434_v48, %v434_v48  ;;  %v1304_v54 = vsel %vm314_vm1, %v433_v49, 0.0  ;;  %v581_v55 = vld [vmem:[#allocation5 + $0x10] sm:$0xff]  ;;  %v579_v4 = vld [vmem:[#allocation5] sm:$0xff]  ;;  %v578_v18 = vld [vmem:[#allocation4] sm:$0xff] }
 0x1be   : > { %530 = vmatpush.msra.mxu0 %v436_v45  ;;  %v499_v57 = vsel %vm314_vm1, %v495_v47, 0.0  ;;  %v439_v58 = vrot.slane %v1304_v54, 4  ;;  %v640_v59 = vmul.f32 %v581_v55, %v581_v55  ;;  %v639_v60 = vmul.f32 %v580_v56, %v580_v56 }
 0x1bf   : > { %v426_v61 = vadd.s32 24, %v423_v51  ;;  %v425_v62 = vadd.s32 16, %v423_v51  ;;  %v424_v63 = vadd.s32 8, %v423_v51  ;;  %vm429_vm3 = vcmp.eq.s32.totalorder %v423_v51, %v428_v52 }
 0x1c0   : > { %531 = vmatpush.msra.mxu0 %v435_v46  ;;  %v446_v0 = vsel %vm429_vm3, %v434_v48, 0.0  ;;  %v498_v1 = vsel %vm314_vm1, %v494_v53, 0.0  ;;  %v440_v2 = vadd.f32 %v439_v58, %v1304_v54  ;;  %v643_v3 = vsel %vm314_vm1, %v639_v60, 0.0 }
 0x1c1   : > { %v1301_v50 = vld [vmem:[#allocation5 + $0x18] sm:$0xff]  ;;  %vm432_vm4 = vcmp.eq.s32.totalorder %v426_v61, %v428_v52  ;;  %vm431_vm5 = vcmp.eq.s32.totalorder %v425_v62, %v428_v52  ;;  %vm430_vm6 = vcmp.eq.s32.totalorder %v424_v63, %v428_v52  ;;  %v450_v5 = vsel %vm314_vm1, %v446_v0, 0.0 }
 0x1c2   : > { %673 = vmatpush.msra.mxu1 %v1301_v50  ;;  %v449_v6 = vsel %vm432_vm4, %v1298_v44, 0.0  ;;  %v448_v7 = vsel %vm431_vm5, %v436_v45, 0.0  ;;  %v447_v8 = vsel %vm430_vm6, %v435_v46, 0.0  ;;  %532 = vmatpush.msra.mxu0 %v434_v48  ;;  %v441_v9 = vrot.slane %v440_v2, 2 }
 0x1c3   : > { %v455_v10 = vsel %vm314_vm1, %v449_v6, 0.0  ;;  %v453_v11 = vsel %vm314_vm1, %v448_v7, 0.0  ;;  %v451_v12 = vsel %vm314_vm1, %v447_v8, 0.0  ;;  %v594_v13 = vsel %vm432_vm4, %v1301_v50, 0.0 }
 0x1c4   : > { %674 = vmatpush.msra.mxu1 %v581_v55  ;;  %v452_v14 = vadd.f32 %v451_v12, %v450_v5  ;;  %v442_v15 = vadd.f32 %v441_v9, %v440_v2  ;;  %v600_v16 = vsel %vm314_vm1, %v594_v13, 0.0  ;;  %v593_v17 = vsel %vm431_vm5, %v581_v55, 0.0 }
 0x1c5   : > { %v598_v19 = vsel %vm314_vm1, %v593_v17, 0.0  ;;  %v592_v20 = vsel %vm430_vm6, %v580_v56, 0.0  ;;  %v591_v21 = vsel %vm429_vm3, %v579_v4, 0.0  ;;  %v638_v22 = vmul.f32 %v579_v4, %v579_v4 }
 0x1c6   : > { %675 = vmatpush.msra.mxu1 %v580_v56  ;;  %v454_v23 = vadd.f32 %v453_v11, %v452_v14  ;;  %v443_v24 = vrot.slane %v442_v15, 1  ;;  %v596_v25 = vsel %vm314_vm1, %v592_v20, 0.0  ;;  %v595_v26 = vsel %vm314_vm1, %v591_v21, 0.0 }
 0x1c7   : > { %v597_v27 = vadd.f32 %v596_v25, %v595_v26  ;;  %v642_v28 = vsel %vm314_vm1, %v638_v22, 0.0  ;;  %v583_v29 = vsel %vm314_vm1, %v578_v18, 0.0  ;;  %v500_v36 = vadd.f32 %v499_v57, %v498_v1 }
 0x1c8   : > { %676 = vmatpush.msra.mxu1 %v579_v4  ;;  %v456_v31 = vadd.f32 %v455_v10, %v454_v23  ;;  %v444_v32 = vadd.f32 %v443_v24, %v442_v15  ;;  %v584_v33 = vrot.slane %v583_v29, 4  ;;  %v501_v37 = vsel %vm314_vm1, %v496_v30, 0.0 }
 0x1c9   : > { %v599_v35 = vadd.f32 %v598_v19, %v597_v27  ;;  %v503_v41 = vsel %vm314_vm1, %v497_v34, 0.0  ;;  %v502_v43 = vadd.f32 %v501_v37, %v500_v36  ;;  %v641_v45 = vmul.f32 %v1301_v50, %v1301_v50 }
 0x1ca   : > { %v457_v38 = vrot.slane %v456_v31, 4  ;;  %v1333_v39 = vmul.f32 0.0625, %v444_v32  ;;  %v585_v40 = vadd.f32 %v584_v33, %v583_v29  ;;  %v644_v46 = vadd.f32 %v643_v3, %v642_v28 }
 0x1cb   : > { %v601_v42 = vadd.f32 %v600_v16, %v599_v35  ;;  %v645_v47 = vsel %vm314_vm1, %v640_v59, 0.0  ;;  %v504_v51 = vadd.f32 %v503_v41, %v502_v43  ;;  %v647_v59 = vsel %vm314_vm1, %v641_v45, 0.0 }
 0x1cc   : > { %884 = vmatmul.msk.f32.vlgmr.msra.gmra.mxu0 %vm314_vm1, %v1333_v39  ;;  %v586_v44 = vrot.slane %v585_v40, 2  ;;  %v548_v48 = vmul.f32 %v1333_v39, %v1333_v39  ;;  %v458_v52 = vadd.f32 %v457_v38, %v456_v31  ;;  %v646_v50 = vadd.f32 %v645_v47, %v644_v46 }
 0x1cd   : > { %v602_v49 = vrot.slane %v601_v42, 4  ;;  %505 = vadd.xlane.f32.xlu0 %v504_v51  ;;  %v463_v58 = vmul.f32 16.0, %v1333_v39 }
 0x1ce   : > { %v587_v53 = vadd.f32 %v586_v44, %v585_v40  ;;  %v549_v55 = vsel %vm482_vm7, %v548_v48, 0.0  ;;  %v459_v57 = vrot.slane %v458_v52, 2  ;;  %v648_v1 = vadd.f32 %v647_v59, %v646_v50 }
 0x1cf   : > { %v603_v56 = vadd.f32 %v602_v49, %v601_v42  ;;  %550 = vadd.xlane.f32.xlu1 %v549_v55  ;;  %v464_v3 = vmul.f32 %v463_v58, %v1333_v39 }
 0x1d0   : > { %v588_v60 = vrot.slane %v587_v53, 1  ;;  %v460_v62 = vadd.f32 %v459_v57, %v458_v52  ;;  %v722_v57 = vld [vmem:[#allocation6] sm:$0xff] }
 0x1d1   : > { %v604_v61 = vrot.slane %v603_v56, 2  ;;  %v723_v58 = vsel %vm314_vm1, %v722_v57, 0.0 }
 0x1d2   : > { %v589_v63 = vadd.f32 %v588_v60, %v587_v53  ;;  %v461_v2 = vrot.slane %v460_v62, 1 }
 0x1d3   : > { %v605_v0 = vadd.f32 %v604_v61, %v603_v56 }
 0x1d4   : > { %v1347_v4 = vmul.f32 0.0625, %v589_v63  ;;  %v462_v6 = vadd.f32 %v461_v2, %v460_v62 }
 0x1d5   : > { %v606_v5 = vrot.slane %v605_v0, 1  ;;  %649 = vadd.xlane.f32.xlu0 %v648_v1 }
 0x1d6   : > { %v608_v7 = vmul.f32 16.0, %v1347_v4  ;;  %885 = vmatmul.msk.f32.vlgmr.msra.gmra.mxu1 %vm314_vm1, %v1347_v4  ;;  %v465_v9 = vsub.f32 %v462_v6, %v464_v3  ;;  %v692_v46 = vmul.f32 %v1347_v4, %v1347_v4 }
 0x1d7   : > { %v607_v8 = vadd.f32 %v606_v5, %v605_v0 }
 0x1d8   : > { %v609_v10 = vmul.f32 %v608_v7, %v1347_v4  ;;  %v466_v11 = vmul.f32 0.06666667, %v465_v9  ;;  %v693_v44 = vsel %vm482_vm7, %v692_v46, 0.0 }
 0x1da   : > { %v610_v12 = vsub.f32 %v607_v8, %v609_v10  ;;  %v565_v13 = vmul.f32 %v466_v11, %v466_v11  ;;  %v467_v14 = vadd.f32 0.0001, %v466_v11 }
 0x1dc   : > { %v611_v15 = vmul.f32 0.06666667, %v610_v12  ;;  %v566_v16 = vsel %vm482_vm7, %v565_v13, 0.0  ;;  %978 = vrsqrt.f32 %v467_v14  ;;  %vm475_vm8 = vcmp.eq.f32.partialorder %v467_v14, inf }
 0x1dd   : > { %567 = vadd.xlane.f32.xlu2 %v566_v16  ;;  %v478_v28 = vand.u32 2147483648, %v467_v14  ;;  %vm477_vm9 = vcmp.eq.f32.partialorder %v467_v14, 0.0 }
 0x1de   : > { %v612_v17 = vadd.f32 0.0001, %v611_v15  ;;  %v709_v47 = vmul.f32 %v611_v15, %v611_v15 }
 0x1e0   : > { %980 = vrsqrt.f32 %v612_v17  ;;  %vm620_vm10 = vcmp.eq.f32.partialorder %v612_v17, inf  ;;  %v623_v33 = vand.u32 2147483648, %v612_v17  ;;  %vm622_vm11 = vcmp.eq.f32.partialorder %v612_v17, 0.0 }
 0x1e1   : > { %v710_v48 = vsel %vm482_vm7, %v709_v47, 0.0 }
 0x1e2   : > { %v979_v18 = vpop.eup %978 }
 0x1e3   : > { %v469_v19 = vmul.f32 %v979_v18, %v467_v14 }
 0x1e5   : > { %v470_v21 = vmul.f32 %v979_v18, %v469_v19 }
 0x1e6   : > { %v981_v20 = vpop.eup %980 }
 0x1e7   : > { %v614_v22 = vmul.f32 %v981_v20, %v612_v17  ;;  %v471_v23 = vmul.f32 0.5, %v470_v21 }
 0x1e9   : > { %v615_v24 = vmul.f32 %v981_v20, %v614_v22  ;;  %v472_v25 = vsub.f32 1.5, %v471_v23 }
 0x1eb   : > { %v616_v26 = vmul.f32 0.5, %v615_v24  ;;  %v473_v27 = vmul.f32 %v979_v18, %v472_v25 }
 0x1ed   : > { %v617_v29 = vsub.f32 1.5, %v616_v26  ;;  %v474_v30 = vmul.f32 %v473_v27, %v467_v14 }
 0x1ef   : > { %v618_v31 = vmul.f32 %v981_v20, %v617_v29  ;;  %v476_v32 = vsel %vm475_vm8, %v467_v14, %v474_v30 }
 0x1f0   : > { %v479_v34 = vsel %vm477_vm9, %v478_v28, %v476_v32 }
 0x1f1   : > { %v619_v35 = vmul.f32 %v618_v31, %v612_v17  ;;  %v480_v36 = vsub.f32 1.0, %v479_v34 }
 0x1f3   : > { %v621_v37 = vsel %vm620_vm10, %v612_v17, %v619_v35  ;;  %v481_v38 = vmax.f32 %v480_v36, 0.0 }
 0x1f4   : > { %v624_v40 = vsel %vm622_vm11, %v623_v33, %v621_v37 }
 0x1f5   : > { %v625_v41 = vsub.f32 1.0, %v624_v40  ;;  %v483_v42 = vsel %vm482_vm7, %v481_v38, 0.0 }
 0x1f6   : > { %484 = vadd.xlane.f32.xlu0 %v483_v42 }
 0x1f7   : > { %v626_v43 = vmax.f32 %v625_v41, 0.0 }
 0x1f9   : > { %v627_v45 = vsel %vm482_vm7, %v626_v43, 0.0 }
 0x1fa   : > { %628 = vadd.xlane.f32.xlu2 %v627_v45 }
 0x1fe   : > { %711 = vadd.xlane.f32.xlu0 %v710_v48 }
 0x202   : > { %694 = vadd.xlane.f32.xlu2 %v693_v44 }
 0x20a   : > { %747 = vadd.xlane.f32.xlu2 %v1304_v54 }
 0x240   : > { %v506_v50 = vpop.xlane.xlu0 %505 }
 0x241   : > { %v507_v60 = vrot.slane %v506_v50, 4 }
 0x242   : > { %v551_v9 = vpop.xlane.xlu1 %550 }
 0x243   : > { %v508_v59 = vadd.f32 %v507_v60, %v506_v50  ;;  %v552_v10 = vrot.slane %v551_v9, 4 }
 0x245   : > { %v509_v61 = vrot.slane %v508_v59, 2  ;;  %v553_v14 = vadd.f32 %v552_v10, %v551_v9 }
 0x247   : > { %v510_v63 = vadd.f32 %v509_v61, %v508_v59  ;;  %v554_v20 = vrot.slane %v553_v14, 2 }
 0x248   : > { %v650_v54 = vpop.xlane.xlu0 %649 }
 0x249   : > { %v534_v49 = vpop.f32.mrf.mxu0  ;;  %v511_v2 = vrot.slane %v510_v63, 1  ;;  %v651_v13 = vrot.slane %v650_v54, 4  ;;  %v555_v29 = vadd.f32 %v554_v20, %v553_v14 }
 0x24a   : > { %v537_v51 = vmul.f32 %v534_v49, %v1333_v39 }
 0x24b   : > { %v512_v5 = vadd.f32 %v511_v2, %v510_v63  ;;  %v652_v19 = vadd.f32 %v651_v13, %v650_v54  ;;  %v556_v38 = vrot.slane %v555_v29, 1 }
 0x24c   : > { %v538_v52 = vsel %vm482_vm7, %v537_v51, 0.0 }
 0x24d   : > { %539 = vadd.xlane.f32.xlu1 %v538_v52  ;;  %v653_v27 = vrot.slane %v652_v19, 2  ;;  %v557_v51 = vadd.f32 %v556_v38, %v555_v29 }
 0x24f   : > { %v654_v37 = vadd.f32 %v653_v27, %v652_v19 }
 0x250   : > { %v568_v7 = vpop.xlane.xlu2 %567 }
 0x251   : > { %v569_v11 = vrot.slane %v568_v7, 4  ;;  %v655_v49 = vrot.slane %v654_v37, 1 }
 0x253   : > { %v678_v53 = vpop.f32.mrf.mxu1  ;;  %v570_v15 = vadd.f32 %v569_v11, %v568_v7  ;;  %v656_v60 = vadd.f32 %v655_v49, %v654_v37 }
 0x254   : > { %v681_v55 = vmul.f32 %v678_v53, %v1347_v4 }
 0x255   : > { %v571_v22 = vrot.slane %v570_v15, 2 }
 0x256   : > { %v682_v56 = vsel %vm482_vm7, %v681_v55, 0.0 }
 0x257   : > { %683 = vadd.xlane.f32.xlu1 %v682_v56  ;;  %v572_v32 = vadd.f32 %v571_v22, %v570_v15 }
 0x259   : > { %v573_v43 = vrot.slane %v572_v32, 1 }
 0x25b   : > { %v574_v56 = vadd.f32 %v573_v43, %v572_v32 }
 0x25f   : > { %724 = vadd.xlane.f32.xlu1 %v723_v58 }
 0x269   : > { %v485_v62 = vpop.xlane.xlu0 %484 }
 0x26a   : > { %v486_v39 = vrot.slane %v485_v62, 4 }
 0x26c   : > { %v487_v0 = vadd.f32 %v486_v39, %v485_v62 }
 0x26d   : > { %v629_v8 = vpop.xlane.xlu2 %628 }
 0x26e   : > { %v488_v1 = vrot.slane %v487_v0, 2  ;;  %v630_v12 = vrot.slane %v629_v8, 4 }
 0x270   : > { %v489_v3 = vadd.f32 %v488_v1, %v487_v0  ;;  %v631_v17 = vadd.f32 %v630_v12, %v629_v8 }
 0x271   : > { %v712_v18 = vpop.xlane.xlu0 %711 }
 0x272   : > { %v490_v4 = vrot.slane %v489_v3, 1  ;;  %v713_v24 = vrot.slane %v712_v18, 4  ;;  %v632_v25 = vrot.slane %v631_v17, 2 }
 0x274   : > { %v491_v6 = vadd.f32 %v490_v4, %v489_v3  ;;  %v714_v31 = vadd.f32 %v713_v24, %v712_v18  ;;  %v633_v35 = vadd.f32 %v632_v25, %v631_v17 }
 0x275   : > { %v695_v16 = vpop.xlane.xlu2 %694 }
 0x276   : > { %894 = vpush %v491_v6  ;;  %v696_v26 = vrot.slane %v695_v16, 4  ;;  %v715_v41 = vrot.slane %v714_v31, 2  ;;  %v634_v44 = vrot.slane %v633_v35, 1 }
 0x277   : > { %896 = vpush %v512_v5 }
 0x278   : > { %v697_v34 = vadd.f32 %v696_v26, %v695_v16  ;;  %v716_v55 = vadd.f32 %v715_v41, %v714_v31  ;;  %v635_v50 = vadd.f32 %v634_v44, %v633_v35 }
 0x27a   : > { %v698_v45 = vrot.slane %v697_v34, 2  ;;  %v717_v61 = vrot.slane %v716_v55, 1 }
 0x27c   : > { %v699_v57 = vadd.f32 %v698_v45, %v697_v34  ;;  %v718_v4 = vadd.f32 %v717_v61, %v716_v55 }
 0x27d   : > { %v748_v33 = vpop.xlane.xlu2 %747 }
 0x27e   : > { %v749_v40 = vrot.slane %v748_v33, 4  ;;  %v700_v39 = vrot.slane %v699_v57, 1 }
 0x280   : > { %v750_v52 = vadd.f32 %v749_v40, %v748_v33  ;;  %v701_v5 = vadd.f32 %v700_v39, %v699_v57 }
 0x282   : > { %v751_v54 = vrot.slane %v750_v52, 2 }
 0x284   : > { %v752_v1 = vadd.f32 %v751_v54, %v750_v52 }
 0x286   : > { %v753_v7 = vrot.slane %v752_v1, 1 }
 0x288   : > { %v754_v10 = vadd.f32 %v753_v7, %v752_v1 }
 0x2a7   : > { %s895_s22 = spop %894 }
 0x2a8   : > { %s897_s5 = spop %896  ;;  %s493_s10 = smul.f32 0.03125, %s895_s22 }
 0x2c0   : > { %v540_v21 = vpop.xlane.xlu1 %539 }
 0x2c1   : > { %v541_v23 = vrot.slane %v540_v21, 4 }
 0x2c3   : > { %v542_v28 = vadd.f32 %v541_v23, %v540_v21 }
 0x2c5   : > { %v543_v30 = vrot.slane %v542_v28, 2 }
 0x2c7   : > { %v544_v36 = vadd.f32 %v543_v30, %v542_v28 }
 0x2c9   : > { %v545_v42 = vrot.slane %v544_v36, 1 }
 0x2ca   : > { %v684_v46 = vpop.xlane.xlu1 %683 }
 0x2cb   : > { %v685_v47 = vrot.slane %v684_v46, 4  ;;  %v546_v48 = vadd.f32 %v545_v42, %v544_v36 }
 0x2cd   : > { %v686_v53 = vadd.f32 %v685_v47, %v684_v46  ;;  %898 = vpush %v546_v48 }
 0x2ce   : > { %900 = vpush %v557_v51 }
 0x2cf   : > { %v687_v58 = vrot.slane %v686_v53, 2  ;;  %902 = vpush %v574_v56 }
 0x2d0   : > { %904 = vpush %v635_v50 }
 0x2d1   : > { %906 = vpush %v656_v60  ;;  %v688_v59 = vadd.f32 %v687_v58, %v686_v53 }
 0x2d2   : > { %v725_v62 = vpop.xlane.xlu1 %724 }
 0x2d3   : > { %v726_v63 = vrot.slane %v725_v62, 4  ;;  %v689_v0 = vrot.slane %v688_v59, 1 }
 0x2d5   : > { %v727_v2 = vadd.f32 %v726_v63, %v725_v62  ;;  %v690_v3 = vadd.f32 %v689_v0, %v688_v59 }
 0x2d7   : > { %v728_v6 = vrot.slane %v727_v2, 2  ;;  %908 = vpush %v690_v3 }
 0x2d8   : > { %910 = vpush %v701_v5 }
 0x2d9   : > { %v729_v8 = vadd.f32 %v728_v6, %v727_v2  ;;  %912 = vpush %v718_v4 }
 0x2db   : > { %v730_v9 = vrot.slane %v729_v8, 1 }
 0x2dd   : > { %v731_v11 = vadd.f32 %v730_v9, %v729_v8 }
 0x2df   : > { %914 = vpush %v731_v11 }
 0x2e0   : > { %916 = vpush %v754_v10 }
 0x2fe   : > { %s899_s19 = spop %898 }
 0x2ff   : > { %s559_s26 = smul.f32 32.0, %s899_s19  ;;  %s901_s27 = spop %900 }
 0x300   : > { %s561_s28 = smul.f32 16.0, %s901_s27  ;;  %s1366_s29 = spop %902 }
 0x301   : > { %s905_s7 = spop %904  ;;  %s560_s8 = ssub.f32 %s897_s5, %s559_s26 }
 0x302   : > { %s562_s9 = smul.f32 %s561_s28, %s561_s28  ;;  %s907_s30 = spop %906 }
 0x303   : > { %s637_s15 = smul.f32 0.03125, %s905_s7 }
 0x304   : > { %s563_s4 = sadd.f32 %s562_s9, %s560_s8 }
 0x305   : > { %s736_s24 = sadd.f32 %s637_s15, %s493_s10 }
 0x306   : > { %s564_s18 = smul.f32 0.004444445, %s563_s4 }
 0x307   : > { %s737_s19 = smul.f32 25.0, %s736_s24 }
 0x308   : > { %s909_s6 = spop %908  ;;  %s576_s1 = ssub.f32 %s564_s18, %s1366_s29 }
 0x309   : > { %s703_s25 = smul.f32 32.0, %s909_s6  ;;  %s911_s23 = spop %910  ;;  %v738_v16 = vstv %s737_s19 }
 0x30a   : > { %s705_s12 = smul.f32 16.0, %s911_s23  ;;  %s913_s0 = spop %912 }
 0x30b   : > { %s704_s11 = ssub.f32 %s907_s30, %s703_s25  ;;  %s577_s28 = smul.f32 0.03125, %s576_s1 }
 0x30c   : > { %s706_s21 = smul.f32 %s705_s12, %s705_s12 }
 0x30e   : > { %s707_s27 = sadd.f32 %s706_s21, %s704_s11 }
 0x310   : > { %s915_s20 = spop %914  ;;  %s708_s5 = smul.f32 0.004444445, %s707_s27 }
 0x311   : > { %v733_v12 = vstv %s915_s20  ;;  %s917_s22 = spop %916 }
 0x312   : > { %v734_v13 = vmul.f32 0.001953125, %v733_v12  ;;  %v756_v14 = vstv %s917_s22  ;;  %s720_s26 = ssub.f32 %s708_s5, %s913_s0 }
 0x313   : > { %757 = vst.msk [vmem:[#allocation13] sm:$0x1] %vm743_vm12, %v756_v14 }
 0x314   : > { %v735_v15 = vmul.f32 25.0, %v734_v13  ;;  %s721_s7 = smul.f32 0.03125, %s720_s26 }
 0x316   : > { %v739_v17 = vadd.f32 %v738_v16, %v735_v15  ;;  %s740_s8 = sadd.f32 %s721_s7, %s577_s28 }
 0x318   : > { %v741_v18 = vstv %s740_s8 }
 0x319   : > { %v742_v19 = vadd.f32 %v741_v18, %v739_v17 }
 0x31b   : > { %744 = vst.msk [vmem:[#allocation12] sm:$0x1] %vm743_vm12, %v742_v19 }
 0x31c PF: > { %p938_p12 = scmp.eq.s32.totalorder %s1188_s16, 1  ;;  %s1147_s20 = smov [#allocation12]  }
 0x31d   : > { %s764_s0 = sshll.u32 %s1147_s20, 4  ;;  %s766_s1 = sshll.u32 %s1405_s2, 4  ;;  %s765_s0 = int_to_ptr.vmem [resolvable:$true] %s764_s0  ;;  %s767_s1 = int_to_ptr.hbm [resolvable:$true] %s766_s1 }
 0x31e   : > { %923 = dma.vmem_to_hbm [thread:$0]  (%p938_p12), %s765_s0, 16, %s767_s1, [#allocation9]  }
 0x31f   : > { %s778_s30 = sshll.u32 %s1406_s3, 4  ;;  %s1148_s4 = smov [#allocation13]   ;;  %s779_s30 = int_to_ptr.hbm [resolvable:$true] %s778_s30 }
 0x320   : > { %s776_s6 = sshll.u32 %s1148_s4, 4  ;;  %s777_s6 = int_to_ptr.vmem [resolvable:$true] %s776_s6 }
 0x321   : > { %925 = dma.vmem_to_hbm [thread:$0]  (%p938_p12), %s777_s6, 16, %s779_s30, [#allocation14]  }
 0x322   : > { %1123 = dma.done.wait (%p938_p12), [#allocation9], 16  }
 0x323   : > { %1125 = vsyncadd (%p938_p12), [#allocation9], 4294967280 }
 0x324   : > { %1127 = dma.done.wait (%p938_p12), [#allocation14], 16  }
 0x325   : > { %1129 = vsyncadd (%p938_p12), [#allocation14], 4294967280 }
 0x326 PF: > { %s1416_s25 = sld [smem:[#allocation19_spill]]  ;;  %p19_p2 = scmp.ge.s32.totalorder %s1191_s17, 4  }
 0x327   : > { %s1417_s12 = smov %s1136_s13  ;;  %s1418_s13 = smov %s1140_s14 }
 0x328   : > { %s1420_s15 = smov %s1191_s17  ;;  %21 = sbr.rel (!%p19_p2) target bundleno = 10 (0xa), region = 94 }
 0x32c   : > { %s1419_s14 = smov %s1416_s25 }
 0x32d   :  { %797 = vsyncpa [#allocation8], 1 }
 0x32e   :  { %799 = vsyncpa [#allocation8 + $0x1], 1 }
 0x32f   :  { %800 = vsyncpa [#allocation11], 1 }
 0x330   :  { %802 = vsyncpa [#allocation11 + $0x1], 1 }
 0x331   :  { %803 = vsyncpa [#allocation9], 1 }
 0x332   :  { %805 = vsyncpa [#allocation9 + $0x1], 1 }
 0x333   :  { %806 = vsyncpa [#allocation14], 1 }

</bundles_post_ra>
